<compile_context>
chip_gen: v5e
topology: v5e:2x2
jax: 0.10.0
libtpu: 0.0.40
codegen_flags: <defaults>
</compile_context>

<pallas_src>
import jax
import jax.numpy as jnp
from jax.experimental import pallas as pl
from jax.experimental.pallas import tpu as pltpu

_LANES = 128
_SUBLANES = 8
_MAX_TK = 2048      # largest reduction tile (multiple of 128 lanes)
_MAX_TM = 1024      # largest batch tile


def _round_up(x, m):
    return ((x + m - 1) // m) * m


def _vmem_budget_bytes():
    """~3/4 of physical VMEM: 96 MiB on v5e/v6e (128 MiB), 48 MiB on v7x (64 MiB)."""
    try:
        cap = int(pltpu.get_tpu_info().vmem_capacity_bytes)
    except Exception:
        cap = 64 << 20  # conservative default (v7x per-core physical)
    return min((cap * 3) // 4, 96 << 20)


def _pick_tk(feature_dim):
    """Reduction tile: full K when small/unaligned, else the largest
    128-aligned divisor of K that is <= _MAX_TK (exact division keeps the
    ragged-block problem off the contraction axis)."""
    if feature_dim <= _MAX_TK or feature_dim % _LANES != 0:
        return feature_dim
    for d in range(_MAX_TK, 0, -_LANES):
        if feature_dim % d == 0:
            return d
    return feature_dim  # unreachable


def _pick_tm(batch, tk, n_pad, x_itemsize, budget):
    """Largest batch tile (multiple of 8, <= _MAX_TM) whose pipelined footprint
    fits the budget: 2x x-tile (double buffer) + 2x f32 out-tile + f32 acc,
    plus a worst-case double-buffered bf16 W tile and bias, ~2 MiB headroom."""
    tm_cap = min(_MAX_TM, _round_up(batch, _SUBLANES))
    per_row = 2 * tk * x_itemsize + 2 * n_pad * 4 + n_pad * 4
    fixed = 2 * tk * n_pad * 2 + n_pad * 4
    avail = budget - fixed - (2 << 20)
    tm = (avail // per_row) // _SUBLANES * _SUBLANES if avail > 0 else _SUBLANES
    return int(max(_SUBLANES, min(tm_cap, tm)))


def _linear_kernel(x_ref, w_ref, b_ref, o_ref, acc_ref):
    # x_ref: (tm, tk) native dtype; w_ref: (tk, n_pad) bf16; b_ref: (1, n_pad) f32
    # o_ref: (tm, n_pad) f32; acc_ref: (tm, n_pad) f32 scratch, resident over k.
    k = pl.program_id(1)

    @pl.when(k == 0)
    def _():
        acc_ref[...] = jnp.zeros_like(acc_ref)

    acc_ref[...] += jnp.dot(
        x_ref[...].astype(jnp.bfloat16),   # in-kernel VPU cast; no HBM copy of x
        w_ref[...],
        preferred_element_type=jnp.float32,
    )

    @pl.when(k == pl.num_programs(1) - 1)
    def _():
        o_ref[...] = (acc_ref[...] + b_ref[...]).astype(o_ref.dtype)


def rcnn_svm_forward(x, weight, bias):
    """Pallas equivalent of RCNNSVM.forward (nn.Linear).

    x:      (batch, feature_dim)        float32 or bfloat16
    weight: (num_classes, feature_dim)  float32 (PyTorch nn.Linear layout)
    bias:   (num_classes,)              float32
    returns (batch, num_classes)        float32
    """
    batch, feature_dim = x.shape
    num_classes = weight.shape[0]

    # Lane-dense class dim (>=128; 129..256 classes pad straight to 256).
    n_pad = _round_up(max(num_classes, _LANES), _LANES)

    tk = _pick_tk(feature_dim)
    k_steps = feature_dim // tk
    budget = _vmem_budget_bytes()
    tm = _pick_tm(batch, tk, n_pad, x.dtype.itemsize, budget)
    batch_tiles = pl.cdiv(batch, tm)

    # One-time, tiny parameter prep: transposed + class-padded bf16 W, f32 bias.
    # (Zero padding keeps the extra logit columns exact; they are sliced off.)
    w_p = jnp.pad(weight.T.astype(jnp.bfloat16),
                  ((0, 0), (0, n_pad - num_classes)))
    b_p = jnp.pad(bias.astype(jnp.float32).reshape(1, num_classes),
                  ((0, 0), (0, n_pad - num_classes)))

    w_reads = batch_tiles if k_steps > 1 else 1
    cost = pl.CostEstimate(
        flops=2 * batch * feature_dim * n_pad,
        transcendentals=0,
        bytes_accessed=int(batch * feature_dim * x.dtype.itemsize
                           + w_reads * feature_dim * n_pad * 2
                           + n_pad * 4
                           + batch * n_pad * 4),
    )

    def _call(single_buffer_resident):
        def _resident_spec(shape, index_map):
            # Grid-invariant operand: request single buffering when supported.
            if single_buffer_resident:
                return pl.BlockSpec(shape, index_map,
                                    pipeline_mode=pl.Buffered(1))
            return pl.BlockSpec(shape, index_map)

        if k_steps == 1:
            w_spec = _resident_spec((tk, n_pad), lambda i, k: (0, 0))
        else:
            w_spec = pl.BlockSpec((tk, n_pad), lambda i, k: (k, 0))
        b_spec = _resident_spec((1, n_pad), lambda i, k: (0, 0))

        return pl.pallas_call(
            _linear_kernel,
            out_shape=jax.ShapeDtypeStruct((batch, n_pad), jnp.float32),
            grid_spec=pltpu.PrefetchScalarGridSpec(
                num_scalar_prefetch=0,
                grid=(batch_tiles, k_steps),          # reduction axis last
                in_specs=[
                    pl.BlockSpec((tm, tk), lambda i, k: (i, k)),   # x stream
                    w_spec,
                    b_spec,
                ],
                out_specs=pl.BlockSpec((tm, n_pad), lambda i, k: (i, 0)),
                scratch_shapes=[pltpu.VMEM((tm, n_pad), jnp.float32)],
            ),
            compiler_params=pltpu.CompilerParams(
                dimension_semantics=("parallel", "arbitrary"),
                vmem_limit_bytes=int(budget),
            ),
            cost_estimate=cost,
        )(x, w_p, b_p)

    if hasattr(pl, "Buffered"):
        try:
            out_padded = _call(True)
        except Exception:
            # Fallback for jax builds that reject buffer_count=1 on the TPU path.
            out_padded = _call(False)
    else:
        out_padded = _call(False)

    return out_padded[:, :num_classes]


if __name__ == "__main__":
    # Small shapes consistent with the module: flattened ROI features -> scores.
    batch = 16
    feature_dim = 128
    num_classes = 8

    key = jax.random.PRNGKey(0)
    kx, kw, kb = jax.random.split(key, 3)

    x = jax.random.normal(kx, (batch, feature_dim), dtype=jnp.float32)

    # Deterministic init mimicking nn.Linear's uniform(-1/sqrt(in), 1/sqrt(in)).
    bound = 1.0 / (feature_dim ** 0.5)
    weight = jax.random.uniform(
        kw, (num_classes, feature_dim), minval=-bound, maxval=bound,
        dtype=jnp.float32)
    bias = jax.random.uniform(
        kb, (num_classes,), minval=-bound, maxval=bound, dtype=jnp.float32)

    out = jax.block_until_ready(rcnn_svm_forward(x, weight, bias))
    assert out.shape == (batch, num_classes)

    # Tight check vs. a reference using the same bf16-quantized operands with
    # f32 accumulation (matches the kernel's arithmetic contract).
    ref_bf16 = (x.astype(jnp.bfloat16).astype(jnp.float32)
                @ weight.astype(jnp.bfloat16).astype(jnp.float32).T + bias)
    assert jnp.allclose(out, ref_bf16, atol=1e-3, rtol=1e-3)

    # Loose check vs. the full-precision PyTorch-equivalent forward.
    ref_f32 = x @ weight.T + bias
    assert jnp.allclose(out, ref_f32, atol=5e-2, rtol=5e-2)

    print("KERNEL_OK")
</pallas_src>

<mosaic_0001>
module attributes {stable_mosaic.version = 11 : i64} {
  func.func @_linear_kernel(%arg0: i32, %arg1: i32, %arg2: memref<16x128xf32, #tpu.memory_space<vmem>>, %arg3: memref<128x128xbf16, #tpu.memory_space<vmem>>, %arg4: memref<1x128xf32, #tpu.memory_space<vmem>>, %arg5: memref<16x128xf32, #tpu.memory_space<vmem>>, %arg6: memref<16x128xf32, #tpu.memory_space<vmem>>) attributes {dimension_semantics = [#tpu.dimension_semantics<parallel>, #tpu.dimension_semantics<arbitrary>], iteration_bounds = array<i64: 1, 1>, scalar_prefetch = 0 : i64, scratch_operands = 1 : i64, tpu.core_type = #tpu.core_type<tc>, window_params = [{transform_indices = @transform_0, window_bounds = array<i64: 16, 128>}, {pipeline_mode = #tpu.pipeline_mode<synchronous>, transform_indices = @transform_1, window_bounds = array<i64: 128, 128>}, {pipeline_mode = #tpu.pipeline_mode<synchronous>, transform_indices = @transform_2, window_bounds = array<i64: 1, 128>}, {transform_indices = @transform_3, window_bounds = array<i64: 16, 128>}]} {
    %c0_i32 = arith.constant 0 : i32
    %0 = arith.cmpi eq, %arg1, %c0_i32 : i32
    %1 = arith.extui %0 : i1 to i32
    %c0_i32_0 = arith.constant 0 : i32
    %2 = arith.cmpi ne, %1, %c0_i32_0 : i32
    scf.if %2 {
      %cst_10 = arith.constant 0.000000e+00 : f32
      %13 = vector.broadcast %cst_10 : f32 to vector<16x128xf32>
      %c0_11 = arith.constant 0 : index
      %c0_12 = arith.constant 0 : index
      %14 = vector.load %arg6[%c0_11, %c0_12] : memref<16x128xf32, #tpu.memory_space<vmem>>, vector<16x128xf32>
      tpu.vector_store %arg6[%c0_11, %c0_12], %13 {strides = array<i32>} : memref<16x128xf32, #tpu.memory_space<vmem>>, vector<16x128xf32>,
    } else {
    }
    %c0 = arith.constant 0 : index
    %c0_1 = arith.constant 0 : index
    %3 = vector.load %arg6[%c0, %c0_1] : memref<16x128xf32, #tpu.memory_space<vmem>>, vector<16x128xf32>
    %c0_2 = arith.constant 0 : index
    %c0_3 = arith.constant 0 : index
    %4 = vector.load %arg2[%c0_2, %c0_3] : memref<16x128xf32, #tpu.memory_space<vmem>>, vector<16x128xf32>
    %5 = arith.truncf %4 : vector<16x128xf32> to vector<16x128xbf16>
    %c0_4 = arith.constant 0 : index
    %c0_5 = arith.constant 0 : index
    %6 = vector.load %arg3[%c0_4, %c0_5] : memref<128x128xbf16, #tpu.memory_space<vmem>>, vector<128x128xbf16>
    %cst = arith.constant dense<0.000000e+00> : vector<16x128xf32>
    %7 = tpu.matmul %5, %6, %cst {dimension_numbers = #tpu.dot_dimension_numbers<[1], [0], [0], [1], [0, 0, 1, 1], [], []>} : vector<16x128xbf16>, vector<128x128xbf16>, vector<16x128xf32> -> vector<16x128xf32>
    %8 = arith.addf %3, %7 : vector<16x128xf32>
    %c0_6 = arith.constant 0 : index
    %c0_7 = arith.constant 0 : index
    %9 = vector.load %arg6[%c0_6, %c0_7] : memref<16x128xf32, #tpu.memory_space<vmem>>, vector<16x128xf32>
    tpu.vector_store %arg6[%c0_6, %c0_7], %8 {strides = array<i32>} : memref<16x128xf32, #tpu.memory_space<vmem>>, vector<16x128xf32>,
    %c0_i32_8 = arith.constant 0 : i32
    %10 = arith.cmpi eq, %arg1, %c0_i32_8 : i32
    %11 = arith.extui %10 : i1 to i32
    %c0_i32_9 = arith.constant 0 : i32
    %12 = arith.cmpi ne, %11, %c0_i32_9 : i32
    scf.if %12 {
      %c0_10 = arith.constant 0 : index
      %c0_11 = arith.constant 0 : index
      %13 = vector.load %arg6[%c0_10, %c0_11] : memref<16x128xf32, #tpu.memory_space<vmem>>, vector<16x128xf32>
      %c0_12 = arith.constant 0 : index
      %c0_13 = arith.constant 0 : index
      %14 = vector.load %arg4[%c0_12, %c0_13] : memref<1x128xf32, #tpu.memory_space<vmem>>, vector<1x128xf32>
      %15 = vector.broadcast %14 : vector<1x128xf32> to vector<16x128xf32>
      %16 = arith.addf %13, %15 : vector<16x128xf32>
      %c0_14 = arith.constant 0 : index
      %c0_15 = arith.constant 0 : index
      %17 = vector.load %arg5[%c0_14, %c0_15] : memref<16x128xf32, #tpu.memory_space<vmem>>, vector<16x128xf32>
      tpu.vector_store %arg5[%c0_14, %c0_15], %16 {strides = array<i32>} : memref<16x128xf32, #tpu.memory_space<vmem>>, vector<16x128xf32>,
    } else {
    }
    return
  }
  func.func @transform_0(%arg0: i32, %arg1: i32) -> (i32, i32) {
    %c0_i32 = arith.constant 0 : i32
    return %arg0, %arg1 : i32, i32
  }
  func.func @transform_1(%arg0: i32, %arg1: i32) -> (i32, i32) {
    %c0_i32 = arith.constant 0 : i32
    %c0_i32_0 = arith.constant 0 : i32
    %c0_i32_1 = arith.constant 0 : i32
    return %c0_i32, %c0_i32_0 : i32, i32
  }
  func.func @transform_2(%arg0: i32, %arg1: i32) -> (i32, i32) {
    %c0_i32 = arith.constant 0 : i32
    %c0_i32_0 = arith.constant 0 : i32
    %c0_i32_1 = arith.constant 0 : i32
    return %c0_i32, %c0_i32_0 : i32, i32
  }
  func.func @transform_3(%arg0: i32, %arg1: i32) -> (i32, i32) {
    %c0_i32 = arith.constant 0 : i32
    %c0_i32_0 = arith.constant 0 : i32
    return %arg0, %c0_i32 : i32, i32
  }
}

module attributes {stable_mosaic.version = 11 : i64} {
  func.func @_linear_kernel(%arg0: i32, %arg1: i32, %arg2: memref<16x128xf32, #tpu.memory_space<vmem>>, %arg3: memref<128x128xbf16, #tpu.memory_space<vmem>>, %arg4: memref<1x128xf32, #tpu.memory_space<vmem>>, %arg5: memref<16x128xf32, #tpu.memory_space<vmem>>, %arg6: memref<16x128xf32, #tpu.memory_space<vmem>>) attributes {dimension_semantics = [#tpu.dimension_semantics<parallel>, #tpu.dimension_semantics<arbitrary>], iteration_bounds = array<i64: 1, 1>, scalar_prefetch = 0 : i64, scratch_operands = 1 : i64, tpu.core_type = #tpu.core_type<tc>, window_params = [{transform_indices = @transform_0, window_bounds = array<i64: 16, 128>}, {pipeline_mode = #tpu.pipeline_mode<synchronous>, transform_indices = @transform_1, window_bounds = array<i64: 128, 128>}, {pipeline_mode = #tpu.pipeline_mode<synchronous>, transform_indices = @transform_2, window_bounds = array<i64: 1, 128>}, {transform_indices = @transform_3, window_bounds = array<i64: 16, 128>}]} {
    %c0_i32 = arith.constant 0 : i32
    %0 = arith.cmpi eq, %arg1, %c0_i32 : i32
    %1 = arith.extui %0 : i1 to i32
    %c0_i32_0 = arith.constant 0 : i32
    %2 = arith.cmpi ne, %1, %c0_i32_0 : i32
    scf.if %2 {
      %cst_10 = arith.constant 0.000000e+00 : f32
      %13 = vector.broadcast %cst_10 : f32 to vector<16x128xf32>
      %c0_11 = arith.constant 0 : index
      %c0_12 = arith.constant 0 : index
      %14 = vector.load %arg6[%c0_11, %c0_12] : memref<16x128xf32, #tpu.memory_space<vmem>>, vector<16x128xf32>
      tpu.vector_store %arg6[%c0_11, %c0_12], %13 {strides = array<i32>} : memref<16x128xf32, #tpu.memory_space<vmem>>, vector<16x128xf32>,
    } else {
    }
    %c0 = arith.constant 0 : index
    %c0_1 = arith.constant 0 : index
    %3 = vector.load %arg6[%c0, %c0_1] : memref<16x128xf32, #tpu.memory_space<vmem>>, vector<16x128xf32>
    %c0_2 = arith.constant 0 : index
    %c0_3 = arith.constant 0 : index
    %4 = vector.load %arg2[%c0_2, %c0_3] : memref<16x128xf32, #tpu.memory_space<vmem>>, vector<16x128xf32>
    %5 = arith.truncf %4 : vector<16x128xf32> to vector<16x128xbf16>
    %c0_4 = arith.constant 0 : index
    %c0_5 = arith.constant 0 : index
    %6 = vector.load %arg3[%c0_4, %c0_5] : memref<128x128xbf16, #tpu.memory_space<vmem>>, vector<128x128xbf16>
    %cst = arith.constant dense<0.000000e+00> : vector<16x128xf32>
    %7 = tpu.matmul %5, %6, %cst {dimension_numbers = #tpu.dot_dimension_numbers<[1], [0], [0], [1], [0, 0, 1, 1], [], []>} : vector<16x128xbf16>, vector<128x128xbf16>, vector<16x128xf32> -> vector<16x128xf32>
    %8 = arith.addf %3, %7 : vector<16x128xf32>
    %c0_6 = arith.constant 0 : index
    %c0_7 = arith.constant 0 : index
    %9 = vector.load %arg6[%c0_6, %c0_7] : memref<16x128xf32, #tpu.memory_space<vmem>>, vector<16x128xf32>
    tpu.vector_store %arg6[%c0_6, %c0_7], %8 {strides = array<i32>} : memref<16x128xf32, #tpu.memory_space<vmem>>, vector<16x128xf32>,
    %c0_i32_8 = arith.constant 0 : i32
    %10 = arith.cmpi eq, %arg1, %c0_i32_8 : i32
    %11 = arith.extui %10 : i1 to i32
    %c0_i32_9 = arith.constant 0 : i32
    %12 = arith.cmpi ne, %11, %c0_i32_9 : i32
    scf.if %12 {
      %c0_10 = arith.constant 0 : index
      %c0_11 = arith.constant 0 : index
      %13 = vector.load %arg6[%c0_10, %c0_11] : memref<16x128xf32, #tpu.memory_space<vmem>>, vector<16x128xf32>
      %c0_12 = arith.constant 0 : index
      %c0_13 = arith.constant 0 : index
      %14 = vector.load %arg4[%c0_12, %c0_13] : memref<1x128xf32, #tpu.memory_space<vmem>>, vector<1x128xf32>
      %15 = vector.broadcast %14 : vector<1x128xf32> to vector<16x128xf32>
      %16 = arith.addf %13, %15 : vector<16x128xf32>
      %c0_14 = arith.constant 0 : index
      %c0_15 = arith.constant 0 : index
      %17 = vector.load %arg5[%c0_14, %c0_15] : memref<16x128xf32, #tpu.memory_space<vmem>>, vector<16x128xf32>
      tpu.vector_store %arg5[%c0_14, %c0_15], %16 {strides = array<i32>} : memref<16x128xf32, #tpu.memory_space<vmem>>, vector<16x128xf32>,
    } else {
    }
    return
  }
  func.func @transform_0(%arg0: i32, %arg1: i32) -> (i32, i32) {
    %c0_i32 = arith.constant 0 : i32
    return %arg0, %arg1 : i32, i32
  }
  func.func @transform_1(%arg0: i32, %arg1: i32) -> (i32, i32) {
    %c0_i32 = arith.constant 0 : i32
    %c0_i32_0 = arith.constant 0 : i32
    %c0_i32_1 = arith.constant 0 : i32
    return %c0_i32, %c0_i32_0 : i32, i32
  }
  func.func @transform_2(%arg0: i32, %arg1: i32) -> (i32, i32) {
    %c0_i32 = arith.constant 0 : i32
    %c0_i32_0 = arith.constant 0 : i32
    %c0_i32_1 = arith.constant 0 : i32
    return %c0_i32, %c0_i32_0 : i32, i32
  }
  func.func @transform_3(%arg0: i32, %arg1: i32) -> (i32, i32) {
    %c0_i32 = arith.constant 0 : i32
    %c0_i32_0 = arith.constant 0 : i32
    return %arg0, %c0_i32 : i32, i32
  }
}

</mosaic_0001>

<bundles_post_ra>
// kernel: tpu_custom_call.1
= control target key start
LH: loop header
LB: loop body
LE: loop exit
PB: predicated region body
PF: predicated region fallthrough
CT: control target
= control target key end

     0   :  { %8 = vsyncpa [#allocation4], 0  ;;  %s344_s0 = inlined_call_operand.hbm [shape: f32[16,128], index: 0, kind: input, shape index: {}]   ;;  %s345_s1 = inlined_call_operand.hbm [shape: bf16[128,128], index: 1, kind: input, shape index: {}]   ;;  %s346_s2 = inlined_call_operand.vmem [shape: f32[1,128], index: 2, kind: input, shape index: {}]   ;;  %s347_s3 = inlined_call_operand.hbm [shape: f32[16,128], index: 3, kind: output, shape index: {}]  }
   0x1   :  { %9 = vsyncpa [#allocation7], 0 }
   0x2   :  { %10 = vsyncpa [#allocation5], 0  ;;  %s15_s14 = sshll.u32 %s344_s0, 4  ;;  %s299_s15 = smov [#allocation3]   ;;  %s16_s14 = int_to_ptr.hbm [resolvable:$true] %s15_s14 }
   0x3   :  { %s17_s16 = sshll.u32 %s299_s15, 4  ;;  %s28_s19 = sshll.u32 %s345_s1, 4  ;;  %s18_s16 = int_to_ptr.vmem [resolvable:$true] %s17_s16  ;;  %s29_s19 = int_to_ptr.hbm [resolvable:$true] %s28_s19 }
   0x4   :  { %s300_s20 = smov 128   ;;  %s301_s21 = smov 8  }
   0x5   :  { %23 = dma.hbm_to_vmem [thread:$0]  %s16_s14, 256, %s18_s16, [#allocation4], %s300_s20, %s300_s20, %s301_s21  }
   0x6   :  { %s302_s22 = smov [#allocation6]   ;;  %s303_s24 = smov 64  }
   0x7   :  { %s30_s23 = sshll.u32 %s302_s22, 4  ;;  %s304_s0 = smov 4   ;;  %s31_s23 = int_to_ptr.vmem [resolvable:$true] %s30_s23 }
   0x8   :  { %36 = dma.hbm_to_vmem [thread:$0]  %s29_s19, 1024, %s31_s23, [#allocation7], %s303_s24, %s303_s24, %s304_s0  }
   0x9   :  { %293 = dma.done.wait [#allocation4], 256  }
   0xa   :  { %294 = vsyncadd [#allocation4], 4294967040 }
   0xb   :  { %295 = dma.done.wait [#allocation7], 1024  }
   0xc   :  { %296 = vsyncadd [#allocation7], 4294966272  ;;  %v212_v0 = vld [vmem:[#allocation6 + $0x38] sm:$0xff]  ;;  %v211_v1 = vld [vmem:[#allocation6 + $0x30] sm:$0xff]  ;;  %s305_s26 = smov [#allocation8]   ;;  %s159_s30 = sshll.u32 %s347_s3, 4  ;;  %s160_s30 = int_to_ptr.hbm [resolvable:$true] %s159_s30 }
   0xd   :  { %122 = vmatpush.bf16.msra.mxu0 %v212_v0  ;;  %v210_v2 = vld [vmem:[#allocation6 + $0x28] sm:$0xff]  ;;  %v209_v3 = vld [vmem:[#allocation6 + $0x20] sm:$0xff]  ;;  %v208_v4 = vld [vmem:[#allocation6 + $0x18] sm:$0xff]  ;;  %s157_s27 = sshll.u32 %s305_s26, 4  ;;  %s158_s27 = int_to_ptr.vmem [resolvable:$true] %s157_s27 }
   0xe   :  { %v207_v5 = vld [vmem:[#allocation6 + $0x10] sm:$0xff]  ;;  %v206_v6 = vld [vmem:[#allocation6 + $0x8] sm:$0xff]  ;;  %v205_v7 = vld [vmem:[#allocation6] sm:$0xff] }
   0xf   :  { %v55_v8 = vld [vmem:[#allocation3] sm:$0xff]  ;;  %v56_v9 = vld [vmem:[#allocation3 + $0x8] sm:$0xff] }
  0x10   :  { %v57_v10 = vpack.c.bf16 %v56_v9, %v55_v8  ;;  %v220_v11 = vld [vmem:[%s346_s2] ss:$0 sm:$0xff] }
  0x11   :  { %123 = vmatpush.bf16.msra.mxu0 %v211_v1 }
  0x15   :  { %124 = vmatpush.bf16.msra.mxu0 %v210_v2 }
  0x19   :  { %125 = vmatpush.bf16.msra.mxu0 %v209_v3 }
  0x1d   :  { %126 = vmatpush.bf16.msra.mxu0 %v208_v4 }
  0x21   :  { %127 = vmatpush.bf16.msra.mxu0 %v207_v5 }
  0x25   :  { %128 = vmatpush.bf16.msra.mxu0 %v206_v6 }
  0x29   :  { %129 = vmatpush.bf16.msra.mxu0 %v205_v7 }
  0x2c   :  { %130 = vmatmul.bf16.vlgmr.msra.gmra.mxu0 %v57_v10 }
  0xa9   :  { %v131_v12 = vpop.f32.mrf.mxu0 }
  0xaa   :  { %v149_v13 = vadd.f32 %v220_v11, %v131_v12 }
  0xac   :  { %151 = vst [vmem:[#allocation8] sm:$0xff] %v149_v13 }
  0xb1   :  { %v133_v14 = vpop.f32.mrf.mxu0 }
  0xb2   :  { %v150_v15 = vadd.f32 %v220_v11, %v133_v14 }
  0xb4   :  { %152 = vst [vmem:[#allocation8 + $0x8] sm:$0xff] %v150_v15 }
  0xb5   :  { %165 = dma.vmem_to_hbm [thread:$0]  %s158_s27, 256, %s160_s30, [#allocation5], %s300_s20, %s300_s20, %s301_s21  }
  0xb6   :  { %297 = dma.done.wait [#allocation5], 256  }
  0xb7   :  { %298 = vsyncadd [#allocation5], 4294967040 }
  0xb8   :  { %170 = vsyncpa [#allocation4], 1 }
  0xb9   :  { %171 = vsyncpa [#allocation7], 1 }
  0xba   :  { %172 = vsyncpa [#allocation5], 1 }

// kernel: tpu_custom_call.1
= control target key start
LH: loop header
LB: loop body
LE: loop exit
PB: predicated region body
PF: predicated region fallthrough
CT: control target
= control target key end

     0   :  { %8 = vsyncpa [#allocation4], 0  ;;  %s344_s0 = inlined_call_operand.hbm [shape: f32[16,128], index: 0, kind: input, shape index: {}]   ;;  %s345_s1 = inlined_call_operand.hbm [shape: bf16[128,128], index: 1, kind: input, shape index: {}]   ;;  %s346_s2 = inlined_call_operand.vmem [shape: f32[1,128], index: 2, kind: input, shape index: {}]   ;;  %s347_s3 = inlined_call_operand.hbm [shape: f32[16,128], index: 3, kind: output, shape index: {}]  }
   0x1   :  { %9 = vsyncpa [#allocation7], 0 }
   0x2   :  { %10 = vsyncpa [#allocation5], 0  ;;  %s15_s14 = sshll.u32 %s344_s0, 4  ;;  %s299_s15 = smov [#allocation3]   ;;  %s16_s14 = int_to_ptr.hbm [resolvable:$true] %s15_s14 }
   0x3   :  { %s17_s16 = sshll.u32 %s299_s15, 4  ;;  %s28_s19 = sshll.u32 %s345_s1, 4  ;;  %s18_s16 = int_to_ptr.vmem [resolvable:$true] %s17_s16  ;;  %s29_s19 = int_to_ptr.hbm [resolvable:$true] %s28_s19 }
   0x4   :  { %s300_s20 = smov 128   ;;  %s301_s21 = smov 8  }
   0x5   :  { %23 = dma.hbm_to_vmem [thread:$0]  %s16_s14, 256, %s18_s16, [#allocation4], %s300_s20, %s300_s20, %s301_s21  }
   0x6   :  { %s302_s22 = smov [#allocation6]   ;;  %s303_s24 = smov 64  }
   0x7   :  { %s30_s23 = sshll.u32 %s302_s22, 4  ;;  %s304_s0 = smov 4   ;;  %s31_s23 = int_to_ptr.vmem [resolvable:$true] %s30_s23 }
   0x8   :  { %36 = dma.hbm_to_vmem [thread:$0]  %s29_s19, 1024, %s31_s23, [#allocation7], %s303_s24, %s303_s24, %s304_s0  }
   0x9   :  { %293 = dma.done.wait [#allocation4], 256  }
   0xa   :  { %294 = vsyncadd [#allocation4], 4294967040 }
   0xb   :  { %295 = dma.done.wait [#allocation7], 1024  }
   0xc   :  { %296 = vsyncadd [#allocation7], 4294966272  ;;  %v212_v0 = vld [vmem:[#allocation6 + $0x38] sm:$0xff]  ;;  %v211_v1 = vld [vmem:[#allocation6 + $0x30] sm:$0xff]  ;;  %s305_s26 = smov [#allocation8]   ;;  %s159_s30 = sshll.u32 %s347_s3, 4  ;;  %s160_s30 = int_to_ptr.hbm [resolvable:$true] %s159_s30 }
   0xd   :  { %122 = vmatpush.bf16.msra.mxu0 %v212_v0  ;;  %v210_v2 = vld [vmem:[#allocation6 + $0x28] sm:$0xff]  ;;  %v209_v3 = vld [vmem:[#allocation6 + $0x20] sm:$0xff]  ;;  %v208_v4 = vld [vmem:[#allocation6 + $0x18] sm:$0xff]  ;;  %s157_s27 = sshll.u32 %s305_s26, 4  ;;  %s158_s27 = int_to_ptr.vmem [resolvable:$true] %s157_s27 }
   0xe   :  { %v207_v5 = vld [vmem:[#allocation6 + $0x10] sm:$0xff]  ;;  %v206_v6 = vld [vmem:[#allocation6 + $0x8] sm:$0xff]  ;;  %v205_v7 = vld [vmem:[#allocation6] sm:$0xff] }
   0xf   :  { %v55_v8 = vld [vmem:[#allocation3] sm:$0xff]  ;;  %v56_v9 = vld [vmem:[#allocation3 + $0x8] sm:$0xff] }
  0x10   :  { %v57_v10 = vpack.c.bf16 %v56_v9, %v55_v8  ;;  %v220_v11 = vld [vmem:[%s346_s2] ss:$0 sm:$0xff] }
  0x11   :  { %123 = vmatpush.bf16.msra.mxu0 %v211_v1 }
  0x15   :  { %124 = vmatpush.bf16.msra.mxu0 %v210_v2 }
  0x19   :  { %125 = vmatpush.bf16.msra.mxu0 %v209_v3 }
  0x1d   :  { %126 = vmatpush.bf16.msra.mxu0 %v208_v4 }
  0x21   :  { %127 = vmatpush.bf16.msra.mxu0 %v207_v5 }
  0x25   :  { %128 = vmatpush.bf16.msra.mxu0 %v206_v6 }
  0x29   :  { %129 = vmatpush.bf16.msra.mxu0 %v205_v7 }
  0x2c   :  { %130 = vmatmul.bf16.vlgmr.msra.gmra.mxu0 %v57_v10 }
  0xa9   :  { %v131_v12 = vpop.f32.mrf.mxu0 }
  0xaa   :  { %v149_v13 = vadd.f32 %v220_v11, %v131_v12 }
  0xac   :  { %151 = vst [vmem:[#allocation8] sm:$0xff] %v149_v13 }
  0xb1   :  { %v133_v14 = vpop.f32.mrf.mxu0 }
  0xb2   :  { %v150_v15 = vadd.f32 %v220_v11, %v133_v14 }
  0xb4   :  { %152 = vst [vmem:[#allocation8 + $0x8] sm:$0xff] %v150_v15 }
  0xb5   :  { %165 = dma.vmem_to_hbm [thread:$0]  %s158_s27, 256, %s160_s30, [#allocation5], %s300_s20, %s300_s20, %s301_s21  }
  0xb6   :  { %297 = dma.done.wait [#allocation5], 256  }
  0xb7   :  { %298 = vsyncadd [#allocation5], 4294967040 }
  0xb8   :  { %170 = vsyncpa [#allocation4], 1 }
  0xb9   :  { %171 = vsyncpa [#allocation7], 1 }
  0xba   :  { %172 = vsyncpa [#allocation5], 1 }

</bundles_post_ra>
